<compile_context>
chip_gen: v6e
topology: v6e:2x2x1
jax: 0.10.0
libtpu: 0.0.40
codegen_flags: <defaults>
</compile_context>

<pallas_src>
import jax
import jax.numpy as jnp
from jax import lax
from jax.experimental import pallas as pl
from jax.experimental.pallas import tpu as pltpu

_NEG_BIG = -1.0e30  # bias value for padded vocab rows: exp underflows to 0


def _skipgram_nll_kernel(context_ref, embds_ref, wT_ref, b_ref, logp_ref,
                         m_ref, l_ref, p_ref):
    kv = pl.program_id(1)
    nv = pl.num_programs(1)
    bb = embds_ref.shape[0]
    tv = wT_ref.shape[1]

    @pl.when(kv == 0)
    def _init():
        m_ref[...] = jnp.full(m_ref.shape, -jnp.inf, m_ref.dtype)
        l_ref[...] = jnp.zeros(l_ref.shape, l_ref.dtype)
        p_ref[...] = jnp.zeros(p_ref.shape, p_ref.dtype)

    # Logits tile: (bb, D) x (D, tv) -> (bb, tv) on the MXU (bf16 in, f32 acc),
    # plus the f32 bias tile.
    logits = jnp.dot(
        embds_ref[...], wT_ref[...],
        preferred_element_type=jnp.float32,
    ) + b_ref[...]

    # Online softmax accumulation over the vocab axis.
    m_prev = m_ref[...]
    m_new = jnp.maximum(m_prev, jnp.max(logits, axis=1, keepdims=True))
    correction = jnp.exp(m_prev - m_new)
    l_ref[...] = correction * l_ref[...] + jnp.sum(
        jnp.exp(logits - m_new), axis=1, keepdims=True)
    m_ref[...] = m_new

    # NLL pick folded into the accumulation: grab the raw logit at the target
    # column if it lives in this vocab tile. Shift the scalar target index
    # instead of offsetting the full (bb, tv) iota.
    cols = lax.broadcasted_iota(jnp.int32, (bb, tv), 1)
    tgt = context_ref[...] - kv * tv                       # (bb, 1) int32
    mask = cols == tgt
    p_ref[...] += jnp.sum(jnp.where(mask, logits, 0.0), axis=1, keepdims=True)

    @pl.when(kv == nv - 1)
    def _finalize():
        lse = m_ref[...] + jnp.log(l_ref[...])
        logp_ref[...] = p_ref[...] - lse  # log_softmax value at the target


def _pick_batch_tile(B, block_b):
    """Largest batch tile <= block_b that divides B and is a multiple of 8;
    prefers >=2 blocks (megacore) when B is large enough."""
    target = min(block_b, B)
    if B >= 16 and target > B // 2:
        target = max(8, B // 2)
    for bb in range(target, 7, -1):
        if B % bb == 0 and bb % 8 == 0:
            return bb
    return B  # fallback: single full-extent block


def skipgram_softmax_loss(center, context, syn0, w1, b1, *,
                          block_b=1024, block_v=1024,
                          compute_dtype=jnp.bfloat16):
    """center, context: integer index arrays (any shape, flattened);
    syn0: (V, D) embedding table; w1: (V, D) Linear weight (PyTorch layout);
    b1: (V,) Linear bias. Returns the scalar mean NLL loss."""
    center_flat = center.reshape(-1).astype(jnp.int32)
    context_flat = context.reshape(-1).astype(jnp.int32)
    B = center_flat.shape[0]
    V, D = w1.shape

    # Real gather (B*D bytes) instead of a one-hot (B,V)@(V,D) matmul, then
    # cast to the MXU compute dtype (accumulation stays f32 in the kernel).
    embds = jnp.take(syn0, center_flat, axis=0).astype(compute_dtype)  # (B, D)
    context2d = context_flat.reshape(B, 1)

    # Pre-transpose the linear weight once so the kernel does a standard
    # (M,K)x(K,N) contraction with a lane-dense vocab tile.
    w1_t = w1.T                                                        # (D, V)

    # Vocab tile: multiple of 128 lanes; pad V so tiles divide evenly.
    if V <= block_v:
        tv = -(-V // 128) * 128
    else:
        tv = max(128, (block_v // 128) * 128)
    n_v = -(-V // tv)
    Vp = n_v * tv
    if Vp != V:
        w1_t = jnp.pad(w1_t, ((0, 0), (0, Vp - V)))
        b1 = jnp.pad(b1, ((0, Vp - V),), constant_values=_NEG_BIG)

    # Pad D to a multiple of 256 so the 256-wide MXU K dimension is full
    # (zero padding does not change the dot product).
    Dp = -(-D // 256) * 256
    if Dp != D:
        embds = jnp.pad(embds, ((0, 0), (0, Dp - D)))
        w1_t = jnp.pad(w1_t, ((0, Dp - D), (0, 0)))

    w1_t = w1_t.astype(compute_dtype)
    b1_2d = b1.astype(jnp.float32).reshape(1, Vp)

    # Batch tile (keeps (8,128)/full-extent alignment; >=2 blocks if possible).
    bb = _pick_batch_tile(B, block_b)
    n_b = B // bb

    grid_spec = pltpu.PrefetchScalarGridSpec(
        num_scalar_prefetch=0,
        grid=(n_b, n_v),
        in_specs=[
            pl.BlockSpec((bb, 1), lambda b, kv: (b, 0)),     # context indices
            pl.BlockSpec((bb, Dp), lambda b, kv: (b, 0)),    # gathered embeds
            pl.BlockSpec((Dp, tv), lambda b, kv: (0, kv)),   # W^T column tile
            pl.BlockSpec((1, tv), lambda b, kv: (0, kv)),    # bias tile
        ],
        out_specs=pl.BlockSpec((bb, 1), lambda b, kv: (b, 0)),
        scratch_shapes=[
            pltpu.VMEM((bb, 1), jnp.float32),   # running max
            pltpu.VMEM((bb, 1), jnp.float32),   # running sum of exp
            pltpu.VMEM((bb, 1), jnp.float32),   # picked target logit
        ],
    )

    w_bytes = jnp.dtype(compute_dtype).itemsize
    cost = pl.CostEstimate(
        flops=2 * B * Vp * Dp,
        transcendentals=B * Vp,
        bytes_accessed=(n_b * Vp * Dp * w_bytes    # streamed weight tiles
                        + B * Dp * w_bytes         # gathered embeddings
                        + n_b * Vp * 4             # bias tiles
                        + B * 4 + B * 4),          # context + output
    )

    logp = pl.pallas_call(
        _skipgram_nll_kernel,
        out_shape=jax.ShapeDtypeStruct((B, 1), jnp.float32),
        grid_spec=grid_spec,
        compiler_params=pltpu.CompilerParams(
            dimension_semantics=("parallel", "arbitrary"),
            vmem_limit_bytes=48 * 1024 * 1024),
        cost_estimate=cost,
    )(context2d, embds, w1_t, b1_2d)

    # nll_loss(..., reduction='mean'): tiny B-element reduction in the wrapper
    # so the batch grid axis can stay core-parallel.
    return -jnp.mean(logp[:, 0])


def _reference_loss(center, context, syn0, w1, b1):
    center_flat = center.reshape(-1)
    context_flat = context.reshape(-1)
    embds = syn0[center_flat]                      # (B, D)
    logits = embds @ w1.T + b1                     # (B, V)
    log_probs = jax.nn.log_softmax(logits, axis=1)
    picked = jnp.take_along_axis(log_probs, context_flat[:, None], axis=1)[:, 0]
    return -jnp.mean(picked)


if __name__ == "__main__":
    # Small synthetic problem consistent with the module's shapes.
    vocab_size = 1000        # V (not a multiple of 128: exercises padding)
    embedding_dim = 256      # D
    batch = 128              # B (center/context index pairs)

    key = jax.random.PRNGKey(0)
    k_syn0, k_w1, k_b1, k_center, k_context = jax.random.split(key, 5)

    # nn.Embedding default init: N(0,1). nn.Linear default: U(-1/sqrt(D), 1/sqrt(D)).
    syn0 = jax.random.normal(k_syn0, (vocab_size, embedding_dim), jnp.float32)
    bound = 1.0 / jnp.sqrt(jnp.float32(embedding_dim))
    w1 = jax.random.uniform(k_w1, (vocab_size, embedding_dim), jnp.float32,
                            -bound, bound)
    b1 = jax.random.uniform(k_b1, (vocab_size,), jnp.float32, -bound, bound)

    center = jax.random.randint(k_center, (batch,), 0, vocab_size, jnp.int32)
    context = jax.random.randint(k_context, (batch,), 0, vocab_size, jnp.int32)

    # Small tiles so the demo exercises both grid axes: grid = (2, 4).
    loss = skipgram_softmax_loss(center, context, syn0, w1, b1,
                                 block_b=64, block_v=256)
    jax.block_until_ready(loss)

    # bf16 MXU inputs (f32 accumulation): tolerance vs. the f32 reference is
    # correspondingly looser.
    ref = _reference_loss(center, context, syn0, w1, b1)
    assert jnp.allclose(loss, ref, rtol=2e-2, atol=2e-2), (loss, ref)

    print("KERNEL_OK")
</pallas_src>

<mosaic_0001>
module attributes {stable_mosaic.version = 11 : i64} {
  func.func @_skipgram_nll_kernel(%arg0: i32, %arg1: i32, %arg2: memref<64x1xi32, #tpu.memory_space<vmem>>, %arg3: memref<64x256xbf16, #tpu.memory_space<vmem>>, %arg4: memref<256x256xbf16, #tpu.memory_space<vmem>>, %arg5: memref<1x256xf32, #tpu.memory_space<vmem>>, %arg6: memref<64x1xf32, #tpu.memory_space<vmem>>, %arg7: memref<64x1xf32, #tpu.memory_space<vmem>>, %arg8: memref<64x1xf32, #tpu.memory_space<vmem>>, %arg9: memref<64x1xf32, #tpu.memory_space<vmem>>) attributes {dimension_semantics = [#tpu.dimension_semantics<parallel>, #tpu.dimension_semantics<arbitrary>], iteration_bounds = array<i64: 2, 4>, scalar_prefetch = 0 : i64, scratch_operands = 3 : i64, tpu.core_type = #tpu.core_type<tc>, window_params = [{transform_indices = @transform_0, window_bounds = array<i64: 64, 1>}, {transform_indices = @transform_1, window_bounds = array<i64: 64, 256>}, {transform_indices = @transform_2, window_bounds = array<i64: 256, 256>}, {transform_indices = @transform_3, window_bounds = array<i64: 1, 256>}, {transform_indices = @transform_4, window_bounds = array<i64: 64, 1>}]} {
    %c0_i32 = arith.constant 0 : i32
    %0 = arith.cmpi eq, %arg1, %c0_i32 : i32
    %1 = arith.extui %0 : i1 to i32
    %c0_i32_0 = arith.constant 0 : i32
    %2 = arith.cmpi ne, %1, %c0_i32_0 : i32
    scf.if %2 {
      %cst_25 = arith.constant 0xFF800000 : f32
      %42 = vector.broadcast %cst_25 : f32 to vector<64x1xf32>
      %c0_26 = arith.constant 0 : index
      %c0_27 = arith.constant 0 : index
      %43 = vector.load %arg7[%c0_26, %c0_27] : memref<64x1xf32, #tpu.memory_space<vmem>>, vector<64x1xf32>
      tpu.vector_store %arg7[%c0_26, %c0_27], %42 {strides = array<i32>} : memref<64x1xf32, #tpu.memory_space<vmem>>, vector<64x1xf32>,
      %cst_28 = arith.constant 0.000000e+00 : f32
      %44 = vector.broadcast %cst_28 : f32 to vector<64x1xf32>
      %c0_29 = arith.constant 0 : index
      %c0_30 = arith.constant 0 : index
      %45 = vector.load %arg8[%c0_29, %c0_30] : memref<64x1xf32, #tpu.memory_space<vmem>>, vector<64x1xf32>
      tpu.vector_store %arg8[%c0_29, %c0_30], %44 {strides = array<i32>} : memref<64x1xf32, #tpu.memory_space<vmem>>, vector<64x1xf32>,
      %cst_31 = arith.constant 0.000000e+00 : f32
      %46 = vector.broadcast %cst_31 : f32 to vector<64x1xf32>
      %c0_32 = arith.constant 0 : index
      %c0_33 = arith.constant 0 : index
      %47 = vector.load %arg9[%c0_32, %c0_33] : memref<64x1xf32, #tpu.memory_space<vmem>>, vector<64x1xf32>
      tpu.vector_store %arg9[%c0_32, %c0_33], %46 {strides = array<i32>} : memref<64x1xf32, #tpu.memory_space<vmem>>, vector<64x1xf32>,
    } else {
    }
    %c0 = arith.constant 0 : index
    %c0_1 = arith.constant 0 : index
    %3 = vector.load %arg3[%c0, %c0_1] : memref<64x256xbf16, #tpu.memory_space<vmem>>, vector<64x256xbf16>
    %c0_2 = arith.constant 0 : index
    %c0_3 = arith.constant 0 : index
    %4 = vector.load %arg4[%c0_2, %c0_3] : memref<256x256xbf16, #tpu.memory_space<vmem>>, vector<256x256xbf16>
    %cst = arith.constant dense<0.000000e+00> : vector<64x256xf32>
    %5 = tpu.matmul %3, %4, %cst {dimension_numbers = #tpu.dot_dimension_numbers<[1], [0], [0], [1], [0, 0, 1, 1], [], []>} : vector<64x256xbf16>, vector<256x256xbf16>, vector<64x256xf32> -> vector<64x256xf32>
    %c0_4 = arith.constant 0 : index
    %c0_5 = arith.constant 0 : index
    %6 = vector.load %arg5[%c0_4, %c0_5] : memref<1x256xf32, #tpu.memory_space<vmem>>, vector<1x256xf32>
    %7 = vector.broadcast %6 : vector<1x256xf32> to vector<64x256xf32>
    %8 = arith.addf %5, %7 : vector<64x256xf32>
    %c0_6 = arith.constant 0 : index
    %c0_7 = arith.constant 0 : index
    %9 = vector.load %arg7[%c0_6, %c0_7] : memref<64x1xf32, #tpu.memory_space<vmem>>, vector<64x1xf32>
    %cst_8 = arith.constant dense<0xFF800000> : vector<64xf32>
    %10 = vector.multi_reduction <maximumf>, %8, %cst_8 [1] : vector<64x256xf32> to vector<64xf32>
    %11 = vector.shape_cast %10 : vector<64xf32> to vector<64x1xf32>
    %12 = arith.maximumf %9, %11 : vector<64x1xf32>
    %13 = arith.subf %9, %12 : vector<64x1xf32>
    %14 = math.exp %13 : vector<64x1xf32>
    %c0_9 = arith.constant 0 : index
    %c0_10 = arith.constant 0 : index
    %15 = vector.load %arg8[%c0_9, %c0_10] : memref<64x1xf32, #tpu.memory_space<vmem>>, vector<64x1xf32>
    %16 = arith.mulf %14, %15 : vector<64x1xf32>
    %17 = vector.broadcast %12 : vector<64x1xf32> to vector<64x256xf32>
    %18 = arith.subf %8, %17 : vector<64x256xf32>
    %19 = math.exp %18 : vector<64x256xf32>
    %cst_11 = arith.constant dense<0.000000e+00> : vector<64xf32>
    %20 = vector.multi_reduction <add>, %19, %cst_11 [1] : vector<64x256xf32> to vector<64xf32>
    %21 = vector.shape_cast %20 : vector<64xf32> to vector<64x1xf32>
    %22 = arith.addf %16, %21 : vector<64x1xf32>
    %c0_12 = arith.constant 0 : index
    %c0_13 = arith.constant 0 : index
    %23 = vector.load %arg8[%c0_12, %c0_13] : memref<64x1xf32, #tpu.memory_space<vmem>>, vector<64x1xf32>
    tpu.vector_store %arg8[%c0_12, %c0_13], %22 {strides = array<i32>} : memref<64x1xf32, #tpu.memory_space<vmem>>, vector<64x1xf32>,
    %c0_14 = arith.constant 0 : index
    %c0_15 = arith.constant 0 : index
    %24 = vector.load %arg7[%c0_14, %c0_15] : memref<64x1xf32, #tpu.memory_space<vmem>>, vector<64x1xf32>
    tpu.vector_store %arg7[%c0_14, %c0_15], %12 {strides = array<i32>} : memref<64x1xf32, #tpu.memory_space<vmem>>, vector<64x1xf32>,
    %25 = tpu.iota {dimensions = array<i32: 1>} : vector<64x256xi32>
    %c0_16 = arith.constant 0 : index
    %c0_17 = arith.constant 0 : index
    %26 = vector.load %arg2[%c0_16, %c0_17] : memref<64x1xi32, #tpu.memory_space<vmem>>, vector<64x1xi32>
    %c256_i32 = arith.constant 256 : i32
    %27 = arith.muli %arg1, %c256_i32 : i32
    %28 = vector.broadcast %27 : i32 to vector<64x1xi32>
    %29 = arith.subi %26, %28 : vector<64x1xi32>
    %30 = vector.broadcast %29 : vector<64x1xi32> to vector<64x256xi32>
    %31 = arith.cmpi eq, %25, %30 : vector<64x256xi32>
    %c0_18 = arith.constant 0 : index
    %c0_19 = arith.constant 0 : index
    %32 = vector.load %arg9[%c0_18, %c0_19] : memref<64x1xf32, #tpu.memory_space<vmem>>, vector<64x1xf32>
    %cst_20 = arith.constant 0.000000e+00 : f32
    %33 = vector.broadcast %cst_20 : f32 to vector<64x256xf32>
    %34 = arith.select %31, %8, %33 : vector<64x256xi1>, vector<64x256xf32>
    %cst_21 = arith.constant dense<0.000000e+00> : vector<64xf32>
    %35 = vector.multi_reduction <add>, %34, %cst_21 [1] : vector<64x256xf32> to vector<64xf32>
    %36 = vector.shape_cast %35 : vector<64xf32> to vector<64x1xf32>
    %37 = arith.addf %32, %36 : vector<64x1xf32>
    %c0_22 = arith.constant 0 : index
    %c0_23 = arith.constant 0 : index
    %38 = vector.load %arg9[%c0_22, %c0_23] : memref<64x1xf32, #tpu.memory_space<vmem>>, vector<64x1xf32>
    tpu.vector_store %arg9[%c0_22, %c0_23], %37 {strides = array<i32>} : memref<64x1xf32, #tpu.memory_space<vmem>>, vector<64x1xf32>,
    %c3_i32 = arith.constant 3 : i32
    %39 = arith.cmpi eq, %arg1, %c3_i32 : i32
    %40 = arith.extui %39 : i1 to i32
    %c0_i32_24 = arith.constant 0 : i32
    %41 = arith.cmpi ne, %40, %c0_i32_24 : i32
    scf.if %41 {
      %c0_25 = arith.constant 0 : index
      %c0_26 = arith.constant 0 : index
      %42 = vector.load %arg7[%c0_25, %c0_26] : memref<64x1xf32, #tpu.memory_space<vmem>>, vector<64x1xf32>
      %c0_27 = arith.constant 0 : index
      %c0_28 = arith.constant 0 : index
      %43 = vector.load %arg8[%c0_27, %c0_28] : memref<64x1xf32, #tpu.memory_space<vmem>>, vector<64x1xf32>
      %44 = math.log %43 : vector<64x1xf32>
      %45 = arith.addf %42, %44 : vector<64x1xf32>
      %c0_29 = arith.constant 0 : index
      %c0_30 = arith.constant 0 : index
      %46 = vector.load %arg9[%c0_29, %c0_30] : memref<64x1xf32, #tpu.memory_space<vmem>>, vector<64x1xf32>
      %47 = arith.subf %46, %45 : vector<64x1xf32>
      %c0_31 = arith.constant 0 : index
      %c0_32 = arith.constant 0 : index
      %48 = vector.load %arg6[%c0_31, %c0_32] : memref<64x1xf32, #tpu.memory_space<vmem>>, vector<64x1xf32>
      tpu.vector_store %arg6[%c0_31, %c0_32], %47 {strides = array<i32>} : memref<64x1xf32, #tpu.memory_space<vmem>>, vector<64x1xf32>,
    } else {
    }
    return
  }
  func.func @transform_0(%arg0: i32, %arg1: i32) -> (i32, i32) {
    %c0_i32 = arith.constant 0 : i32
    %c0_i32_0 = arith.constant 0 : i32
    return %arg0, %c0_i32 : i32, i32
  }
  func.func @transform_1(%arg0: i32, %arg1: i32) -> (i32, i32) {
    %c0_i32 = arith.constant 0 : i32
    %c0_i32_0 = arith.constant 0 : i32
    return %arg0, %c0_i32 : i32, i32
  }
  func.func @transform_2(%arg0: i32, %arg1: i32) -> (i32, i32) {
    %c0_i32 = arith.constant 0 : i32
    %c0_i32_0 = arith.constant 0 : i32
    return %c0_i32, %arg1 : i32, i32
  }
  func.func @transform_3(%arg0: i32, %arg1: i32) -> (i32, i32) {
    %c0_i32 = arith.constant 0 : i32
    %c0_i32_0 = arith.constant 0 : i32
    return %c0_i32, %arg1 : i32, i32
  }
  func.func @transform_4(%arg0: i32, %arg1: i32) -> (i32, i32) {
    %c0_i32 = arith.constant 0 : i32
    %c0_i32_0 = arith.constant 0 : i32
    return %arg0, %c0_i32 : i32, i32
  }
}

</mosaic_0001>

<bundles_post_ra>
// kernel: tpu_custom_call.1
= control target key start
LH: loop header
LB: loop body
LE: loop exit
PB: predicated region body
PF: predicated region fallthrough
CT: control target
= control target key end

     0   :  { %s2163_s0 = inlined_call_operand.vmem [shape: s32[128,1], index: 0, kind: input, shape index: {}]   ;;  %s2164_s1 = inlined_call_operand.vmem [shape: bf16[128,256], index: 1, kind: input, shape index: {}]   ;;  %s2165_s2 = inlined_call_operand.hbm [shape: bf16[256,1024], index: 2, kind: input, shape index: {}]   ;;  %s2166_s3 = inlined_call_operand.hbm [shape: f32[1,1024], index: 3, kind: input, shape index: {}]   ;;  %s2167_s4 = inlined_call_operand.vmem [shape: f32[128,1], index: 4, kind: output, shape index: {}]  }
   0x1   :  { %2169 = sst [smem:[#allocation13_spill]] %s2165_s2 }
   0x2   :  { %9 = vsyncpa [#allocation6], 0 }
   0x3   :  { %11 = vsyncpa [#allocation6 + $0x1], 0 }
   0x4   :  { %12 = vsyncpa [#allocation8], 0 }
   0x5   :  { %14 = vsyncpa [#allocation8 + $0x1], 0  ;;  %s1677_s15 = smov 0   ;;  %s1679_s16 = smov 0  }
   0x6   :  { %s1681_s17 = smov 0   ;;  %s1683_s18 = smov 0  }
   0x7   :  { %s1685_s19 = smov 0   ;;  %s1687_s20 = smov 0  }
   0x8   :  { %s1689_s21 = smov 0   ;;  %s1691_s22 = smov 0  }
   0x9 LB: > { %s1208_s23 = sadd.s32 4294967295, %s1642_s22   ;;  %s29_s24 = sadd.s32 1, %s1634_s20  ;;  %s1642_s22 = sphi %s1691_s22, %s20_s22   ;;  %s1638_s21 = sphi %s1689_s21, %s2185_s21   ;;  %s1634_s20 = sphi %s1687_s20, %s2184_s20   ;;  %s1630_s19 = sphi %s1685_s19, %s2183_s19   ;;  %s1626_s18 = sphi %s1683_s18, %s2182_s18   ;;  %s1622_s17 = sphi %s1681_s17, %s2181_s17   ;;  %s1618_s16 = sphi %s1679_s16, %s2180_s16   ;;  %s1614_s15 = sphi %s1677_s15, %s2179_s15  }
   0xa   : > { %p30_p0 = scmp.ge.s32.totalorder %s29_s24, 4  ;;  %s32_s25 = sadd.s32 1, %s1638_s21 }
   0xb   : > { %s91_s26 = sadd.s32 1, %s1622_s17  ;;  %p98_p1 = scmp.ne.s32.totalorder %s1622_s17, %s1618_s16 }
   0xc   : > { %s2187_s24 = smov (%p30_p0, %s29_s24), 0  ;;  %s2189_s25 = smov (!%p30_p0, %s32_s25), %s1638_s21 }
   0xd   : > { %2170 = sst [smem:[#allocation11_spill]] %s2187_s24  ;;  %s88_s27 = ssub.s32 %s1634_s20, %s2187_s24 }
   0xe   : > { %p99_p2 = scmp.eq.s32.totalorder %s1642_s22, 0  ;;  %p34_p3 = scmp.ge.s32.totalorder %s2189_s25, 2 }
   0xf   : > { %p89_p4 = scmp.eq.s32.totalorder %s88_s27, 0  ;;  %p104_p6 = scmp.ne.s32.totalorder %s1618_s16, %s1614_s15 }
  0x10   : > { %p1727_p5 = por %p99_p2, %p98_p1  ;;  %s2191_s25 = smov (%p34_p3, %s2189_s25), 0 }
  0x11   : > { %2172 = sst [smem:[#allocation12_spill]] %s2191_s25  ;;  %p105_p7 = scmp.eq.s32.totalorder %s1208_s23, 0 }
  0x12   : > { %s1735_s29 = scalar_select %p89_p4, %s1622_s17, %s91_s26  }
  0x13   : > { %p1319_p8 = scmp.lt.s32.totalorder %s1642_s22, 8  ;;  %s1739_s30 = sand.u32 1, %s1622_s17  }
  0x14   : > { %p1741_p9 = por %p105_p7, %p104_p6  ;;  %s1212_s6 = sshll.u32 %s1739_s30, 8 }
  0x15   : > { %s1273_s7 = sshll.u32 %s1634_s20, 7  ;;  %s2174_s2 = sld [smem:[#allocation13_spill]] }
  0x16   : > { %s203_s11 = scalar_lea.vmem [#allocation5], %s1212_s6  ;;  %p1752_p10 = pnand %p1319_p8, %p1727_p5 }
  0x17   : > { %s210_s12 = sshll.u32 %s203_s11, 4  ;;  %p1218_p11 = scmp.ge.s32.totalorder %s1642_s22, 1  ;;  %s211_s12 = int_to_ptr.vmem [resolvable:$true] %s210_s12 }
  0x18   : > { %s200_s14 = scalar_lea.sflag [#allocation6], %s1739_s30  ;;  %p1518_p12 = pneg %p1752_p10 }
  0x19   : > { %s1529_s15 = scalar_lea.vmem %s211_s12, 4096  ;;  %s1644_s23 = smov [#allocation5]  }
  0x1a   : > { %p1530_p13 = scmp.ne.s32.totalorder %s211_s12, %s1529_s15  ;;  %s1534_s26 = sshll.u32 %s1644_s23, 4  ;;  %s1535_s26 = int_to_ptr.vmem [resolvable:$false] %s1534_s26 }
  0x1b   : > { %s209_s10 = scalar_lea.hbm %s2174_s2, %s1273_s7  ;;  %s1536_s27 = scalar_lea.vmem %s1535_s26, 8192 }
  0x1c   : > { %p1532_p0 = pnand %p1530_p13, %p1518_p12  ;;  %p1537_p2 = scmp.lt.s32.totalorder %s211_s12, %s1535_s26 }
  0x1d   : > { %p1538_p3 = scmp.lt.s32.totalorder %s1536_s27, %s1529_s15 }
  0x1e   : > { %p1533_p1 = pneg %p1532_p0 }
  0x1f   : > { %p1539_p4 = por %p1538_p3, %p1537_p2 }
  0x21   : > { %p1540_p5 = pnand %p1539_p4, %p1533_p1 }
  0x23   : > { %1543 = shalt.err (!%p1540_p5)
}
  0x24   : > { %s1645_s28 = smov 512   ;;  %s1646_s6 = smov 128  }
  0x25   : > { %s1647_s7 = smov 8   ;;  %p237_p6 = scmp.lt.s32.totalorder %s1642_s22, 9 }
  0x26   : > { %1315 = dma.hbm_to_vmem [thread:$0]  (!%p1752_p10), %s209_s10, 4096, %s211_s12, %s200_s14, %s1645_s28, %s1646_s6, %s1647_s7  }
  0x27   : > { %s1215_s8 = sshll.u32 %s1739_s30, 1  ;;  %s1274_s9 = sshll.u32 %s1634_s20, 5 }
  0x28   : > { %p1770_p7 = pnand %p1218_p11, %p237_p6  ;;  %s230_s26 = scalar_lea.hbm %s2166_s3, %s1274_s9 }
  0x29   : > { %s224_s27 = scalar_lea.vmem [#allocation7], %s1215_s8  ;;  %s221_s25 = scalar_lea.sflag [#allocation8], %s1739_s30 }
  0x2a   : > { %s232_s2 = sshll.u32 %s224_s27, 4  ;;  %s1648_s10 = smov [#allocation7]   ;;  %s233_s2 = int_to_ptr.vmem [resolvable:$true] %s232_s2 }
  0x2b   : > { %s1557_s24 = scalar_lea.vmem %s233_s2, 32  ;;  %s1562_s12 = sshll.u32 %s1648_s10, 4  ;;  %s1563_s12 = int_to_ptr.vmem [resolvable:$false] %s1562_s12 }
  0x2c   : > { %p1558_p8 = scmp.ne.s32.totalorder %s233_s2, %s1557_s24  ;;  %s1564_s14 = scalar_lea.vmem %s1563_s12, 64 }
  0x2d   : > { %p1565_p11 = scmp.lt.s32.totalorder %s233_s2, %s1563_s12  ;;  %p1566_p1 = scmp.lt.s32.totalorder %s1564_s14, %s1557_s24 }
  0x2e   : > { %p1560_p13 = pnand %p1558_p8, %p1518_p12 }
  0x2f   : > { %p1567_p2 = por %p1566_p1, %p1565_p11 }
  0x30   : > { %p1561_p0 = pneg %p1560_p13 }
  0x32   : > { %p1568_p3 = pnand %p1567_p2, %p1561_p0 }
  0x34   : > { %1571 = shalt.err (!%p1568_p3)
}
  0x35   : > { %1318 = dma.hbm_to_vmem [thread:$0]  (!%p1752_p10), %s230_s26, 32, %s233_s2, %s221_s25  }
  0x36   : > { %241 = sbr.rel (%p1770_p7) target bundleno = 845 (0x34d), region = 36  ;;  %s243_s30 = sand.u32 (!%p1770_p7), 1, %s1618_s16  }
  0x37   : > { %s1219_s28 = sshll.u32 (!%p1770_p7), %s243_s30, 8  ;;  %s244_s6 = scalar_lea.sflag (!%p1770_p7), [#allocation6], %s243_s30 }
  0x38   : > { %s1786_s7 = scalar_lea.vmem (!%p1770_p7), [#allocation5], %s1219_s28 }
  0x3b   : > { %1605 = dma.done.wait (%p1741_p9), %s244_s6, 4096  }
  0x3c   : > { %1607 = vsyncadd (%p1741_p9), %s244_s6, 4294963200  ;;  %s1220_s24 = sshll.u32 %s243_s30, 1  ;;  %s253_s8 = scalar_lea.sflag [#allocation8], %s243_s30 }
  0x3d   : > { %s1792_s13 = scalar_lea.vmem [#allocation7], %s1220_s24 }
  0x3e   : > { %1609 = dma.done.wait (%p1741_p9), %s253_s8, 32  }
  0x3f   : > { %1611 = vsyncadd (%p1741_p9), %s253_s8, 4294967264  ;;  %s1221_s2 = sshll.u32 %s1630_s19, 3  ;;  %p1228_p9 = scmp.ne.s32.totalorder %s1626_s18, 0 }
  0x40   : > { %p298_p10 = scmp.lt.s32.totalorder %s1221_s2, 15 }
  0x41   : > { %321 = sbr.rel (%p1228_p9) target bundleno = 83 (0x53), region = 48 }
  0x42   : > { %s2193_s2 = smov (!%p298_p10, %s1221_s2), 15 }
  0x43   : > { %s1222_s25 = sshll.u32 %s2193_s2, 3 }
  0x44   : > { %s1802_s15 = scalar_lea.vmem %s2163_s0, %s1222_s25  ;;  %s1807_s27 = scalar_lea.vmem %s2164_s1, %s1222_s25 }
  0x45   : > { %s1812_s5 = scalar_lea.vmem %s2167_s4, %s1222_s25 }
  0x46   : > { %vm322_vm0 = vcmask 7168   ;;  %v1649_v0 = vmov -inf   ;;  %v1650_v1 = vmov 0.0  }
  0x47   : > { %323 = vst.msk [vmem:[#allocation2] sm:$0xff] %vm322_vm0, %v1649_v0  ;;  %324 = vst.msk [vmem:[#allocation2 + $0x8] sm:$0xff] %vm322_vm0, %v1649_v0 }
  0x48   : > { %325 = vst.msk [vmem:[#allocation2 + $0x10] sm:$0xff] %vm322_vm0, %v1649_v0  ;;  %326 = vst.msk [vmem:[#allocation2 + $0x18] sm:$0xff] %vm322_vm0, %v1649_v0 }
  0x49   : > { %327 = vst.msk [vmem:[#allocation2 + $0x20] sm:$0xff] %vm322_vm0, %v1649_v0  ;;  %328 = vst.msk [vmem:[#allocation2 + $0x28] sm:$0xff] %vm322_vm0, %v1649_v0 }
  0x4a   : > { %329 = vst.msk [vmem:[#allocation2 + $0x30] sm:$0xff] %vm322_vm0, %v1649_v0  ;;  %330 = vst.msk [vmem:[#allocation2 + $0x38] sm:$0xff] %vm322_vm0, %v1649_v0 }
  0x4b   : > { %331 = vst.msk [vmem:[#allocation3] sm:$0xff] %vm322_vm0, %v1650_v1  ;;  %332 = vst.msk [vmem:[#allocation3 + $0x8] sm:$0xff] %vm322_vm0, %v1650_v1 }
  0x4c   : > { %333 = vst.msk [vmem:[#allocation3 + $0x10] sm:$0xff] %vm322_vm0, %v1650_v1  ;;  %334 = vst.msk [vmem:[#allocation3 + $0x18] sm:$0xff] %vm322_vm0, %v1650_v1 }
  0x4d   : > { %335 = vst.msk [vmem:[#allocation3 + $0x20] sm:$0xff] %vm322_vm0, %v1650_v1  ;;  %336 = vst.msk [vmem:[#allocation3 + $0x28] sm:$0xff] %vm322_vm0, %v1650_v1 }
  0x4e   : > { %337 = vst.msk [vmem:[#allocation3 + $0x30] sm:$0xff] %vm322_vm0, %v1650_v1  ;;  %338 = vst.msk [vmem:[#allocation3 + $0x38] sm:$0xff] %vm322_vm0, %v1650_v1 }
  0x4f   : > { %339 = vst.msk [vmem:[#allocation4] sm:$0xff] %vm322_vm0, %v1650_v1  ;;  %340 = vst.msk [vmem:[#allocation4 + $0x8] sm:$0xff] %vm322_vm0, %v1650_v1 }
  0x50   : > { %341 = vst.msk [vmem:[#allocation4 + $0x10] sm:$0xff] %vm322_vm0, %v1650_v1  ;;  %342 = vst.msk [vmem:[#allocation4 + $0x18] sm:$0xff] %vm322_vm0, %v1650_v1 }
  0x51   : > { %343 = vst.msk [vmem:[#allocation4 + $0x20] sm:$0xff] %vm322_vm0, %v1650_v1  ;;  %344 = vst.msk [vmem:[#allocation4 + $0x28] sm:$0xff] %vm322_vm0, %v1650_v1 }
  0x52   : > { %345 = vst.msk [vmem:[#allocation4 + $0x30] sm:$0xff] %vm322_vm0, %v1650_v1  ;;  %346 = vst.msk [vmem:[#allocation4 + $0x38] sm:$0xff] %vm322_vm0, %v1650_v1 }
  0x53 PF: > { %v1392_v2 = vld [vmem:[%s1786_s7 + $0x74] ss:$8 sps:$4 sm:$0xff]   ;;  %v1394_v3 = vld [vmem:[%s1786_s7 + $0x70] ss:$8 sps:$4 sm:$0xff]   ;;  %v1395_v4 = vld [vmem:[%s1786_s7 + $0x64] ss:$8 sps:$4 sm:$0xff]   ;;  %v389_v42 = vlaneseq }
  0x54   : > { %599 = vmatprep.subr.bf16.mxu0 %v1392_v2  ;;  %1276 = vmatprep.subr.bf16.mxu1 %v1392_v2  ;;  %v1397_v5 = vld [vmem:[%s1786_s7 + $0x60] ss:$8 sps:$4 sm:$0xff]   ;;  %v1398_v6 = vld [vmem:[%s1786_s7 + $0x54] ss:$8 sps:$4 sm:$0xff]   ;;  %v1400_v7 = vld [vmem:[%s1786_s7 + $0x50] ss:$8 sps:$4 sm:$0xff]  }
  0x55   : > { %600 = vmatpush1.bf16.msra.mxu0 %v1394_v3  ;;  %1292 = vmatpush1.bf16.msra.mxu1 %v1394_v3  ;;  %v1401_v8 = vld [vmem:[%s1786_s7 + $0x44] ss:$8 sps:$4 sm:$0xff]   ;;  %v1403_v9 = vld [vmem:[%s1786_s7 + $0x40] ss:$8 sps:$4 sm:$0xff]   ;;  %v1404_v10 = vld [vmem:[%s1786_s7 + $0x34] ss:$8 sps:$4 sm:$0xff]  }
  0x56   : > { %601 = vmatprep.subr.bf16.mxu0 %v1395_v4  ;;  %1277 = vmatprep.subr.bf16.mxu1 %v1395_v4  ;;  %v1406_v11 = vld [vmem:[%s1786_s7 + $0x30] ss:$8 sps:$4 sm:$0xff]   ;;  %v1407_v12 = vld [vmem:[%s1786_s7 + $0x24] ss:$8 sps:$4 sm:$0xff]   ;;  %v1409_v13 = vld [vmem:[%s1786_s7 + $0x20] ss:$8 sps:$4 sm:$0xff]  }
  0x57   : > { %v1410_v14 = vld [vmem:[%s1786_s7 + $0x14] ss:$8 sps:$4 sm:$0xff]   ;;  %v1442_v15 = vld [vmem:[%s1807_s27 + $0x4] ss:$8 sps:$4 sm:$0xff]   ;;  %v1412_v16 = vld [vmem:[%s1786_s7 + $0x10] ss:$8 sps:$4 sm:$0xff]  }
  0x58   : > { %v1445_v17 = vld [vmem:[%s1807_s27 + $0x24] ss:$8 sps:$4 sm:$0xff]   ;;  %631 = vmatprep.mubr.bf16.mxu0 %v1442_v15  ;;  %v1415_v19 = vld [vmem:[%s1786_s7] ss:$8 sps:$4 sm:$0xff]   ;;  %v1416_v20 = vld [vmem:[%s1786_s7 + $0xf4] ss:$8 sps:$4 sm:$0xff]  }
  0x59   : > { %602 = vmatpush1.bf16.msra.mxu0 %v1397_v5  ;;  %1293 = vmatpush1.bf16.msra.mxu1 %v1397_v5  ;;  %v1413_v18 = vld [vmem:[%s1786_s7 + $0x4] ss:$8 sps:$4 sm:$0xff]   ;;  %v1418_v21 = vld [vmem:[%s1786_s7 + $0xf0] ss:$8 sps:$4 sm:$0xff]   ;;  %v1421_v23 = vld [vmem:[%s1786_s7 + $0xe0] ss:$8 sps:$4 sm:$0xff]  }
  0x5a   : > { %603 = vmatprep.subr.bf16.mxu0 %v1398_v6  ;;  %1278 = vmatprep.subr.bf16.mxu1 %v1398_v6  ;;  %v1419_v22 = vld [vmem:[%s1786_s7 + $0xe4] ss:$8 sps:$4 sm:$0xff]   ;;  %v1422_v24 = vld [vmem:[%s1786_s7 + $0xd4] ss:$8 sps:$4 sm:$0xff]   ;;  %v1424_v25 = vld [vmem:[%s1786_s7 + $0xd0] ss:$8 sps:$4 sm:$0xff]  }
  0x5b   : > { %651 = vmatprep.mubr.bf16.mxu1 %v1445_v17  ;;  %v1425_v26 = vld [vmem:[%s1786_s7 + $0xc4] ss:$8 sps:$4 sm:$0xff]   ;;  %v1427_v27 = vld [vmem:[%s1786_s7 + $0xc0] ss:$8 sps:$4 sm:$0xff]   ;;  %v1428_v28 = vld [vmem:[%s1786_s7 + $0xb4] ss:$8 sps:$4 sm:$0xff]  }
  0x5c   : > { %v1430_v29 = vld [vmem:[%s1786_s7 + $0xb0] ss:$8 sps:$4 sm:$0xff]   ;;  %v1431_v30 = vld [vmem:[%s1786_s7 + $0xa4] ss:$8 sps:$4 sm:$0xff]   ;;  %v1433_v31 = vld [vmem:[%s1786_s7 + $0xa0] ss:$8 sps:$4 sm:$0xff]  }
  0x5d   : > { %604 = vmatpush1.bf16.msra.mxu0 %v1400_v7  ;;  %1294 = vmatpush1.bf16.msra.mxu1 %v1400_v7  ;;  %v1434_v32 = vld [vmem:[%s1786_s7 + $0x94] ss:$8 sps:$4 sm:$0xff]   ;;  %v1436_v33 = vld [vmem:[%s1786_s7 + $0x90] ss:$8 sps:$4 sm:$0xff]   ;;  %v1437_v34 = vld [vmem:[%s1786_s7 + $0x84] ss:$8 sps:$4 sm:$0xff]  }
  0x5e   : > { %605 = vmatprep.subr.bf16.mxu0 %v1401_v8  ;;  %1279 = vmatprep.subr.bf16.mxu1 %v1401_v8  ;;  %v1439_v35 = vld [vmem:[%s1786_s7 + $0x80] ss:$8 sps:$4 sm:$0xff]   ;;  %v1446_v38 = vld [vmem:[%s1807_s27 + $0x14] ss:$8 sps:$4 sm:$0xff]   ;;  %v1448_v40 = vld [vmem:[%s1807_s27 + $0x10] ss:$8 sps:$4 sm:$0xff]  }
  0x5f   : > { %v1440_v36 = vld [vmem:[%s1807_s27] ss:$8 sps:$4 sm:$0xff]   ;;  %v1449_v39 = vld [vmem:[%s1807_s27 + $0x34] ss:$8 sps:$4 sm:$0xff]   ;;  %v1451_v41 = vld [vmem:[%s1807_s27 + $0x30] ss:$8 sps:$4 sm:$0xff]  }
  0x60   : > { %v1443_v37 = vld [vmem:[%s1807_s27 + $0x20] ss:$8 sps:$4 sm:$0xff]   ;;  %v390_v43 = vshrl.u32 %v389_v42, 7  ;;  %s1269_s19 = sshll.u32 %s1626_s18, 8  ;;  %vm872_vm1 = vcmask 7168   ;;  %p1270_p12 = scmp.ne.s32.totalorder %s1626_s18, 3 }
  0x61   : > { %606 = vmatpush1.bf16.msra.mxu0 %v1403_v9  ;;  %1295 = vmatpush1.bf16.msra.mxu1 %v1403_v9  ;;  %v387_v46 = vld [vmem:[%s1792_s13] sm:$0x3] }
  0x62   : > { %607 = vmatprep.subr.bf16.mxu0 %v1404_v10  ;;  %1280 = vmatprep.subr.bf16.mxu1 %v1404_v10  ;;  %v391_v44 = vsub.s32 0, %v390_v43  ;;  %v395_v45 = vsub.s32 1, %v390_v43 }
  0x64   : > { %v392_v47 = vrot.slane %v387_v46, %v391_v44  ;;  %v396_v48 = vrot.slane %v387_v46, %v395_v45 }
  0x65   : > { %608 = vmatpush1.bf16.msra.mxu0 %v1406_v11  ;;  %1296 = vmatpush1.bf16.msra.mxu1 %v1406_v11 }
  0x66   : > { %609 = vmatprep.subr.bf16.mxu0 %v1407_v12  ;;  %1281 = vmatprep.subr.bf16.mxu1 %v1407_v12 }
  0x69   : > { %610 = vmatpush1.bf16.msra.mxu0 %v1409_v13  ;;  %1297 = vmatpush1.bf16.msra.mxu1 %v1409_v13 }
  0x6a   : > { %611 = vmatprep.subr.bf16.mxu0 %v1410_v14  ;;  %1282 = vmatprep.subr.bf16.mxu1 %v1410_v14 }
  0x6d   : > { %612 = vmatpush1.bf16.msra.mxu0 %v1412_v16  ;;  %1298 = vmatpush1.bf16.msra.mxu1 %v1412_v16 }
  0x6e   : > { %613 = vmatprep.subr.bf16.mxu0 %v1413_v18  ;;  %1283 = vmatprep.subr.bf16.mxu1 %v1413_v18 }
  0x71   : > { %614 = vmatpush1.bf16.msra.mxu0 %v1415_v19  ;;  %1299 = vmatpush1.bf16.msra.mxu1 %v1415_v19 }
  0x72   : > { %615 = vmatprep.subr.bf16.mxu0 %v1416_v20  ;;  %1284 = vmatprep.subr.bf16.mxu1 %v1416_v20 }
  0x75   : > { %616 = vmatpush2.bf16.msra.mxu0 %v1418_v21  ;;  %1300 = vmatpush2.bf16.msra.mxu1 %v1418_v21 }
  0x76   : > { %617 = vmatprep.subr.bf16.mxu0 %v1419_v22  ;;  %1285 = vmatprep.subr.bf16.mxu1 %v1419_v22 }
  0x79   : > { %618 = vmatpush2.bf16.msra.mxu0 %v1421_v23  ;;  %1301 = vmatpush2.bf16.msra.mxu1 %v1421_v23 }
  0x7a   : > { %619 = vmatprep.subr.bf16.mxu0 %v1422_v24  ;;  %1286 = vmatprep.subr.bf16.mxu1 %v1422_v24  ;;  %v1651_v24 = vmov 0  }
  0x7b   : > { %1390 = vset.pattern.permute.xlu0 %v1651_v24  ;;  %1391 = vset.pattern.permute.xlu1 %v1651_v24  ;;  %v896_v24 = vld [vmem:[%s1802_s15 + $0x20] sm:$0xff] }
  0x7d   : > { %620 = vmatpush2.bf16.msra.mxu0 %v1424_v25  ;;  %1302 = vmatpush2.bf16.msra.mxu1 %v1424_v25 }
  0x7e   : > { %621 = vmatprep.subr.bf16.mxu0 %v1425_v26  ;;  %1287 = vmatprep.subr.bf16.mxu1 %v1425_v26  ;;  %v1930_v26 = vld [vmem:[#allocation2] sm:$0xff] }
  0x81   : > { %622 = vmatpush2.bf16.msra.mxu0 %v1427_v27  ;;  %1303 = vmatpush2.bf16.msra.mxu1 %v1427_v27 }
  0x82   : > { %623 = vmatprep.subr.bf16.mxu0 %v1428_v28  ;;  %1288 = vmatprep.subr.bf16.mxu1 %v1428_v28  ;;  %v893_v28 = vld [vmem:[%s1802_s15 + $0x8] sm:$0xff] }
  0x85   : > { %624 = vmatpush2.bf16.msra.mxu0 %v1430_v29  ;;  %1304 = vmatpush2.bf16.msra.mxu1 %v1430_v29  ;;  %v1933_v29 = vstv %s1269_s19 }
  0x86   : > { %625 = vmatprep.subr.bf16.mxu0 %v1431_v30  ;;  %1289 = vmatprep.subr.bf16.mxu1 %v1431_v30 }
  0x89   : > { %626 = vmatpush2.bf16.msra.mxu0 %v1433_v31  ;;  %1305 = vmatpush2.bf16.msra.mxu1 %v1433_v31  ;;  %v1938_v31 = vld [vmem:[#allocation2 + $0x28] sm:$0xff] }
  0x8a   : > { %627 = vmatprep.subr.bf16.mxu0 %v1434_v32  ;;  %1290 = vmatprep.subr.bf16.mxu1 %v1434_v32  ;;  %v1940_v32 = vld [vmem:[#allocation2 + $0x20] sm:$0xff] }
  0x8d   : > { %628 = vmatpush2.bf16.msra.mxu0 %v1436_v33  ;;  %1306 = vmatpush2.bf16.msra.mxu1 %v1436_v33 }
  0x8e   : > { %629 = vmatprep.subr.bf16.mxu0 %v1437_v34  ;;  %1291 = vmatprep.subr.bf16.mxu1 %v1437_v34  ;;  %v903_v34 = vsub.s32 %v893_v28, %v1933_v29 }
  0x91   : > { %630 = vmatpush2.bf16.msra.mxu0 %v1439_v35  ;;  %1307 = vmatpush2.bf16.msra.mxu1 %v1439_v35 }
  0x94   : > { %632 = vmatmul.mubr.bf16.vlgmr.msra.gmra.mxu0 %v1440_v36  ;;  %652 = vmatmul.mubr.bf16.vlgmr.msra.gmra.mxu1 %v1443_v37  ;;  %v895_v37 = vld [vmem:[%s1802_s15 + $0x18] sm:$0xff] }
  0x95   : > { %641 = vmatprep.mubr.bf16.mxu0 %v1446_v38  ;;  %661 = vmatprep.mubr.bf16.mxu1 %v1449_v39  ;;  %v905_v45 = vsub.s32 %v895_v37, %v1933_v29 }
  0x9c   : > { %642 = vmatmul.mubr.bf16.gmra.mxu0 %v1448_v40  ;;  %662 = vmatmul.mubr.bf16.gmra.mxu1 %v1451_v41  ;;  %v1955_v40 = vld [vmem:[#allocation2 + $0x8] sm:$0xff]  ;;  %v1957_v41 = vld [vmem:[#allocation2 + $0x10] sm:$0xff] }
 0x154   : > { %v633_v49 = vpop.f32.mrf.mxu0  ;;  %v653_v50 = vpop.f32.mrf.mxu1 }
 0x155   : > { %v1881_v53 = vadd.f32 %v633_v49, %v392_v47  ;;  %v1885_v57 = vadd.f32 %v653_v50, %v392_v47 }
 0x156   : > { %v635_v51 = vpop.f32.mrf.mxu0  ;;  %v655_v52 = vpop.f32.mrf.mxu1 }
 0x157   : > { %v1883_v54 = vadd.f32 %v635_v51, %v396_v48  ;;  %v1887_v58 = vadd.f32 %v655_v52, %v396_v48  ;;  %v1976_v51 = vld [vmem:[#allocation2 + $0x18] sm:$0xff]  ;;  %v1978_v52 = vld [vmem:[#allocation2 + $0x30] sm:$0xff] }
 0x158   : > { %v637_v55 = vpop.f32.mrf.mxu0  ;;  %v657_v56 = vpop.f32.mrf.mxu1 }
 0x159   : > { %v680_v59 = vmax.f32 %v1881_v53, %v1883_v54  ;;  %v1891_v62 = vadd.f32 %v657_v56, %v392_v47  ;;  %v692_v5 = vmax.f32 %v1885_v57, %v1887_v58  ;;  %v1903_v6 = vadd.f32 %v637_v55, %v392_v47 }
 0x15a   : > { %v639_v60 = vpop.f32.mrf.mxu0  ;;  %v659_v61 = vpop.f32.mrf.mxu1 }
 0x15b   : > { %v1893_v63 = vadd.f32 %v659_v61, %v396_v48  ;;  %681 = vmax.xlane.f32.xlu0 %v680_v59  ;;  %v1895_v2 = vadd.f32 %v639_v60, %v396_v48 }
 0x15c   : > { %v643_v0 = vpop.f32.mrf.mxu0  ;;  %v663_v1 = vpop.f32.mrf.mxu1 }
 0x15d   : > { %v1897_v3 = vadd.f32 %v643_v0, %v392_v47  ;;  %v695_v4 = vmax.f32 %v1891_v62, %v1893_v63  ;;  %v1907_v10 = vadd.f32 %v663_v1, %v392_v47  ;;  %v683_v15 = vmax.f32 %v1903_v6, %v1895_v2  ;;  %v899_v0 = vld [vmem:[%s1802_s15 + $0x38] sm:$0xff] }
 0x15e   : > { %v645_v7 = vpop.f32.mrf.mxu0  ;;  %v665_v8 = vpop.f32.mrf.mxu1 }
 0x15f   : > { %696 = vmax.xlane.f32.xlu1 %v695_v4  ;;  %693 = vmax.xlane.f32.xlu0 %v692_v5  ;;  %v1905_v9 = vadd.f32 %v645_v7, %v396_v48  ;;  %v1909_v11 = vadd.f32 %v665_v8, %v396_v48  ;;  %v1997_v5 = vld [vmem:[#allocation2 + $0x38] sm:$0xff] }
 0x160   : > { %v647_v12 = vpop.f32.mrf.mxu0  ;;  %v667_v13 = vpop.f32.mrf.mxu1 }
 0x161   : > { %v1911_v14 = vadd.f32 %v647_v12, %v392_v47  ;;  %v686_v16 = vmax.f32 %v1897_v3, %v1905_v9  ;;  %v1917_v18 = vadd.f32 %v667_v13, %v392_v47  ;;  %v698_v22 = vmax.f32 %v1907_v10, %v1909_v11 }
 0x162   : > { %v649_v17 = vpop.f32.mrf.mxu0  ;;  %v669_v19 = vpop.f32.mrf.mxu1  ;;  %v909_v12 = vsub.s32 %v899_v0, %v1933_v29 }
 0x163   : > { %684 = vmax.xlane.f32.xlu0 %v683_v15  ;;  %v1919_v20 = vadd.f32 %v649_v17, %v396_v48  ;;  %687 = vmax.xlane.f32.xlu1 %v686_v16  ;;  %v1921_v21 = vadd.f32 %v669_v19, %v396_v48  ;;  %v897_v48 = vld [vmem:[%s1802_s15 + $0x28] sm:$0xff]  ;;  %v892_v17 = vld [vmem:[%s1802_s15] sm:$0xff] }
 0x164   : > { %v907_v59 = vsub.s32 %v897_v48, %v1933_v29  ;;  %v902_v19 = vsub.s32 %v892_v17, %v1933_v29 }
 0x165   : > { %v689_v23 = vmax.f32 %v1911_v14, %v1919_v20  ;;  %v701_v25 = vmax.f32 %v1917_v18, %v1921_v21 }
 0x167   : > { %690 = vmax.xlane.f32.xlu1 %v689_v23  ;;  %699 = vmax.xlane.f32.xlu0 %v698_v22  ;;  %v894_v22 = vld [vmem:[%s1802_s15 + $0x10] sm:$0xff] }
 0x168   : > { %v904_v23 = vsub.s32 %v894_v22, %v1933_v29 }
 0x16b   : > { %702 = vmax.xlane.f32.xlu1 %v701_v25  ;;  %v906_v25 = vsub.s32 %v896_v24, %v1933_v29 }
 0x1e4   : > { %v682_v27 = vpop.xlane.xlu0 %681 }
 0x1e5   : > { %v1936_v30 = vmax.f32 %v1930_v26, %v682_v27  ;;  %v898_v27 = vld [vmem:[%s1802_s15 + $0x30] sm:$0xff] }
 0x1e6   : > { %v908_v28 = vsub.s32 %v898_v27, %v1933_v29 }
 0x1e7   : > { %v712_v33 = vsub.f32 %v1930_v26, %v1936_v30  ;;  %881 = vst.msk [vmem:[#allocation2] sm:$0xff] %vm872_vm1, %v1936_v30  ;;  %754 = vperm.xlu0 %1390, %v1936_v30   ;;  %v736_v30 = vld [vmem:[#allocation3] sm:$0xff] }
 0x1e8   : > { %v697_v35 = vpop.xlane.xlu1 %696  ;;  %v694_v36 = vpop.xlane.xlu0 %693 }
 0x1e9   : > { %v1950_v38 = vmax.f32 %v1938_v31, %v697_v35  ;;  %v1953_v39 = vmax.f32 %v1940_v32, %v694_v36 }
 0x1eb   : > { %v717_v43 = vsub.f32 %v1938_v31, %v1950_v38  ;;  %886 = vst.msk [vmem:[#allocation2 + $0x28] sm:$0xff] %vm872_vm1, %v1950_v38  ;;  %v716_v44 = vsub.f32 %v1940_v32, %v1953_v39  ;;  %885 = vst.msk [vmem:[#allocation2 + $0x20] sm:$0xff] %vm872_vm1, %v1953_v39  ;;  %914 = vperm.xlu0 %1390, %v903_v34   ;;  %774 = vperm.xlu1 %1391, %v1953_v39   ;;  %v2029_v34 = vand.u32 127, %v389_v42 }
 0x1ec   : > { %v685_v46 = vpop.xlane.xlu0 %684  ;;  %v688_v47 = vpop.xlane.xlu1 %687 }
 0x1ed   : > { %v1971_v49 = vmax.f32 %v1955_v40, %v685_v46  ;;  %v1974_v50 = vmax.f32 %v1957_v41, %v688_v47 }
 0x1ef   : > { %v713_v55 = vsub.f32 %v1955_v40, %v1971_v49  ;;  %882 = vst.msk [vmem:[#allocation2 + $0x8] sm:$0xff] %vm872_vm1, %v1971_v49  ;;  %v714_v56 = vsub.f32 %v1957_v41, %v1974_v50  ;;  %883 = vst.msk [vmem:[#allocation2 + $0x10] sm:$0xff] %vm872_vm1, %v1974_v50  ;;  %920 = vperm.xlu0 %1390, %v905_v45   ;;  %759 = vperm.xlu1 %1391, %v1971_v49   ;;  %v2034_v45 = vadd.s32 128, %v2029_v34 }
 0x1f0   : > { %v691_v60 = vpop.xlane.xlu1 %690  ;;  %v700_v61 = vpop.xlane.xlu0 %699 }
 0x1f1   : > { %v1992_v1 = vmax.f32 %v1976_v51, %v691_v60  ;;  %v1995_v4 = vmax.f32 %v1978_v52, %v700_v61  ;;  %v724_v32 = vmul.f32 1.442695, %v714_v56 }
 0x1f3   : > { %v715_v7 = vsub.f32 %v1976_v51, %v1992_v1  ;;  %884 = vst.msk [vmem:[#allocation2 + $0x18] sm:$0xff] %vm872_vm1, %v1992_v1  ;;  %926 = vperm.xlu0 %1390, %v907_v59   ;;  %779 = vperm.xlu1 %1391, %v1950_v38   ;;  %v718_v8 = vsub.f32 %v1978_v52, %v1995_v4  ;;  %887 = vst.msk [vmem:[#allocation2 + $0x30] sm:$0xff] %vm872_vm1, %v1995_v4  ;;  %v728_v38 = vmul.f32 1.442695, %v716_v44 }
 0x1f4   : > { %v703_v13 = vpop.xlane.xlu1 %702 }
 0x1f5   : > { %v2010_v15 = vmax.f32 %v1997_v5, %v703_v13  ;;  %v726_v31 = vmul.f32 1.442695, %v715_v7  ;;  %v732_v40 = vmul.f32 1.442695, %v718_v8 }
 0x1f7   : > { %v719_v16 = vsub.f32 %v1997_v5, %v2010_v15  ;;  %888 = vst.msk [vmem:[#allocation2 + $0x38] sm:$0xff] %vm872_vm1, %v2010_v15  ;;  %932 = vperm.xlu0 %1390, %v909_v12   ;;  %764 = vperm.xlu1 %1391, %v1974_v50   ;;  %v952_v5 = vld [vmem:[#allocation4 + $0x10] sm:$0xff] }
 0x1fb   : > { %784 = vperm.xlu1 %1391, %v1995_v4  }
 0x1ff   : > { %769 = vperm.xlu1 %1391, %v1992_v1  }
 0x203   : > { %789 = vperm.xlu1 %1391, %v2010_v15  }
 0x207   : > { %911 = vperm.xlu1 %1391, %v902_v19  }
 0x20b   : > { %917 = vperm.xlu1 %1391, %v904_v23  }
 0x20f   : > { %923 = vperm.xlu1 %1391, %v906_v25  }
 0x213   : > { %929 = vperm.xlu1 %1391, %v908_v28  }
 0x262   : > { %v755_v35 = vpop.permute.xlu0 %754 }
 0x263   : > { %v792_v36 = vsub.f32 %v1881_v53, %v755_v35  ;;  %v793_v37 = vsub.f32 %v1883_v54, %v755_v35 }
 0x265   : > { %v808_v46 = vmul.f32 1.442695, %v792_v36  ;;  %v810_v47 = vmul.f32 1.442695, %v793_v37 }
 0x266   : > { %v775_v48 = vpop.permute.xlu1 %774  ;;  %v915_v59 = vpop.permute.xlu0 %914 }
 0x267   : > { %1452 = vpow2.f32 %v808_v46  ;;  %vm936_vm2 = vcmp.eq.s32.totalorder %v2029_v34, %v915_v59  ;;  %vm937_vm3 = vcmp.eq.s32.totalorder %v2034_v45, %v915_v59  ;;  %v800_v59 = vsub.f32 %v1885_v57, %v775_v48 }
 0x268   : > { %1454 = vpow2.f32 %v810_v47  ;;  %v960_v42 = vsel %vm936_vm2, %v1903_v6, 0.0  ;;  %v961_v29 = vsel %vm937_vm3, %v1895_v2, 0.0 }
 0x269   : > { %v977_v0 = vadd.f32 %v961_v29, %v960_v42  ;;  %v801_v42 = vsub.f32 %v1887_v58, %v775_v48 }
 0x26a   : > { %v760_v60 = vpop.permute.xlu1 %759  ;;  %v921_v61 = vpop.permute.xlu0 %920 }
 0x26b   : > { %vm940_vm4 = vcmp.eq.s32.totalorder %v2029_v34, %v921_v61  ;;  %vm941_vm5 = vcmp.eq.s32.totalorder %v2034_v45, %v921_v61  ;;  %978 = vadd.xlane.f32.xlu1 %v977_v0  ;;  %v824_v0 = vmul.f32 1.442695, %v800_v59 }
 0x26c   : > { %v964_v12 = vsel %vm940_vm4, %v1911_v14, 0.0  ;;  %v965_v13 = vsel %vm941_vm5, %v1919_v20, 0.0 }
 0x26d   : > { %v983_v22 = vadd.f32 %v965_v13, %v964_v12  ;;  %v794_v12 = vsub.f32 %v1903_v6, %v760_v60 }
 0x26e   : > { %v780_v17 = vpop.permute.xlu1 %779  ;;  %v927_v19 = vpop.permute.xlu0 %926 }
 0x26f   : > { %v802_v23 = vsub.f32 %v1891_v62, %v780_v17  ;;  %v803_v24 = vsub.f32 %v1893_v63, %v780_v17  ;;  %vm944_vm6 = vcmp.eq.s32.totalorder %v2029_v34, %v927_v19  ;;  %vm945_vm7 = vcmp.eq.s32.totalorder %v2034_v45, %v927_v19  ;;  %984 = vadd.xlane.f32.xlu1 %v983_v22 }
 0x270   : > { %v968_v25 = vsel %vm944_vm6, %v1891_v62, 0.0  ;;  %v969_v35 = vsel %vm945_vm7, %v1893_v63, 0.0  ;;  %v826_v62 = vmul.f32 1.442695, %v801_v42  ;;  %v795_v19 = vsub.f32 %v1895_v2, %v760_v60 }
 0x271   : > { %v828_v27 = vmul.f32 1.442695, %v802_v23  ;;  %v830_v28 = vmul.f32 1.442695, %v803_v24  ;;  %v989_v37 = vadd.f32 %v969_v35, %v968_v25  ;;  %v812_v24 = vmul.f32 1.442695, %v794_v12 }
 0x272   : > { %v765_v36 = vpop.permute.xlu1 %764  ;;  %v814_v35 = vmul.f32 1.442695, %v795_v19 }
 0x273   : > { %1456 = vpow2.f32 %v828_v27  ;;  %990 = vadd.xlane.f32.xlu1 %v989_v37  ;;  %v796_v25 = vsub.f32 %v1897_v3, %v765_v36 }
 0x274   : > { %v1453_v46 = vpop.eup %1452  ;;  %1458 = vpow2.f32 %v830_v28 }
 0x275   : > { %v1455_v47 = vpop.eup %1454  ;;  %1460 = vpow2.f32 %v824_v0 }
 0x276   : > { %v785_v29 = vpop.permute.xlu1 %784  ;;  %v840_v61 = vadd.f32 %v1455_v47, %v1453_v46  ;;  %1462 = vpow2.f32 %v826_v62  ;;  %v816_v47 = vmul.f32 1.442695, %v796_v25  ;;  %v933_v25 = vpop.permute.xlu0 %932 }
 0x277   : > { %v804_v59 = vsub.f32 %v1907_v10, %v785_v29  ;;  %v805_v0 = vsub.f32 %v1909_v11, %v785_v29  ;;  %vm948_vm14 = vcmp.eq.s32.totalorder %v2029_v34, %v933_v25  ;;  %vm949_vm15 = vcmp.eq.s32.totalorder %v2034_v45, %v933_v25  ;;  %v954_v25 = vld [vmem:[#allocation4 + $0x20] sm:$0xff] }
 0x278   : > { %841 = vadd.xlane.f32.xlu1 %v840_v61 }
 0x27a   : > { %v770_v13 = vpop.permute.xlu1 %769 }
 0x27b   : > { %v798_v63 = vsub.f32 %v1911_v14, %v770_v13  ;;  %v799_v17 = vsub.f32 %v1919_v20, %v770_v13  ;;  %v797_v20 = vsub.f32 %v1905_v9, %v765_v36  ;;  %v832_v13 = vmul.f32 1.442695, %v804_v59 }
 0x27d   : > { %v820_v22 = vmul.f32 1.442695, %v798_v63  ;;  %v822_v23 = vmul.f32 1.442695, %v799_v17  ;;  %v818_v36 = vmul.f32 1.442695, %v797_v20 }
 0x27e   : > { %v790_v48 = vpop.permute.xlu1 %789 }
 0x27f   : > { %1464 = vpow2.f32 %v820_v22  ;;  %v806_v27 = vsub.f32 %v1917_v18, %v790_v48  ;;  %v807_v6 = vsub.f32 %v1921_v21, %v790_v48 }
 0x280   : > { %v1457_v28 = vpop.eup %1456  ;;  %1466 = vpow2.f32 %v822_v23 }
 0x281   : > { %v1459_v14 = vpop.eup %1458  ;;  %v836_v37 = vmul.f32 1.442695, %v806_v27  ;;  %v838_v2 = vmul.f32 1.442695, %v807_v6  ;;  %1468 = vpow2.f32 %v812_v24 }
 0x282   : > { %v912_v60 = vpop.permute.xlu1 %911  ;;  %v855_v46 = vadd.f32 %v1459_v14, %v1457_v28  ;;  %v1461_v19 = vpop.eup %1460 }
 0x283   : > { %1470 = vpow2.f32 %v836_v37  ;;  %vm934_vm8 = vcmp.eq.s32.totalorder %v2029_v34, %v912_v60  ;;  %vm935_vm9 = vcmp.eq.s32.totalorder %v2034_v45, %v912_v60  ;;  %v1463_v23 = vpop.eup %1462 }
 0x284   : > { %1472 = vpow2.f32 %v838_v2  ;;  %856 = vadd.xlane.f32.xlu1 %v855_v46  ;;  %v958_v42 = vsel %vm934_vm8, %v1881_v53, 0.0  ;;  %v959_v61 = vsel %vm935_vm9, %v1883_v54, 0.0  ;;  %v834_v53 = vmul.f32 1.442695, %v805_v0 }
 0x285   : > { %1474 = vpow2.f32 %v814_v35  ;;  %v974_v62 = vadd.f32 %v959_v61, %v958_v42  ;;  %v852_v35 = vadd.f32 %v1463_v23, %v1461_v19 }
 0x286   : > { %v918_v12 = vpop.permute.xlu1 %917  ;;  %1476 = vpow2.f32 %v816_v47 }
 0x287   : > { %vm938_vm10 = vcmp.eq.s32.totalorder %v2029_v34, %v918_v12  ;;  %vm939_vm11 = vcmp.eq.s32.totalorder %v2034_v45, %v918_v12  ;;  %975 = vadd.xlane.f32.xlu0 %v974_v62  ;;  %1478 = vpow2.f32 %v818_v36  ;;  %v720_v12 = vmul.f32 1.442695, %v712_v33 }
 0x288   : > { %v962_v63 = vsel %vm938_vm10, %v1897_v3, 0.0  ;;  %v963_v17 = vsel %vm939_vm11, %v1905_v9, 0.0  ;;  %1480 = vpow2.f32 %v832_v13  ;;  %v951_v13 = vld [vmem:[#allocation4 + $0x8] sm:$0xff] }
 0x289   : > { %v980_v54 = vadd.f32 %v963_v17, %v962_v63  ;;  %1482 = vpow2.f32 %v834_v53  ;;  %v955_v53 = vld [vmem:[#allocation4 + $0x28] sm:$0xff] }
 0x28a   : > { %v924_v22 = vpop.permute.xlu1 %923  ;;  %1484 = vpow2.f32 %v720_v12  ;;  %v742_v12 = vld [vmem:[#allocation3 + $0x30] sm:$0xff] }
 0x28b   : > { %vm942_vm12 = vcmp.eq.s32.totalorder %v2029_v34, %v924_v22  ;;  %vm943_vm13 = vcmp.eq.s32.totalorder %v2034_v45, %v924_v22  ;;  %981 = vadd.xlane.f32.xlu0 %v980_v54 }
 0x28c   : > { %v1465_v29 = vpop.eup %1464  ;;  %v966_v24 = vsel %vm942_vm12, %v1885_v57, 0.0  ;;  %v967_v48 = vsel %vm943_vm13, %v1887_v58, 0.0  ;;  %v972_v57 = vsel %vm948_vm14, %v1917_v18, 0.0  ;;  %v973_v58 = vsel %vm949_vm15, %v1921_v21, 0.0 }
 0x28d   : > { %v1467_v3 = vpop.eup %1466  ;;  %v986_v9 = vadd.f32 %v967_v48, %v966_v24  ;;  %v995_v47 = vadd.f32 %v973_v58, %v972_v57  ;;  %v741_v24 = vld [vmem:[#allocation3 + $0x28] sm:$0xff]  ;;  %v722_v48 = vmul.f32 1.442695, %v713_v55 }
 0x28e   : > { %v849_v27 = vadd.f32 %v1467_v3, %v1465_v29  ;;  %v1469_v6 = vpop.eup %1468  ;;  %v930_v59 = vpop.permute.xlu1 %929  ;;  %v950_v3 = vld [vmem:[#allocation4] sm:$0xff] }
 0x28f   : > { %987 = vadd.xlane.f32.xlu0 %v986_v9  ;;  %vm946_vm0 = vcmp.eq.s32.totalorder %v2029_v34, %v930_v59  ;;  %vm947_vm2 = vcmp.eq.s32.totalorder %v2034_v45, %v930_v59  ;;  %v953_v34 = vld [vmem:[#allocation4 + $0x18] sm:$0xff]  ;;  %v730_v45 = vmul.f32 1.442695, %v717_v43  ;;  %v734_v43 = vmul.f32 1.442695, %v719_v16  ;;  %v740_v9 = vld [vmem:[#allocation3 + $0x20] sm:$0xff] }
 0x290   : > { %v1471_v28 = vpop.eup %1470  ;;  %850 = vadd.xlane.f32.xlu1 %v849_v27  ;;  %v970_v18 = vsel %vm946_vm0, %v1907_v10, 0.0  ;;  %v971_v21 = vsel %vm947_vm2, %v1909_v11, 0.0  ;;  %v739_v16 = vld [vmem:[#allocation3 + $0x18] sm:$0xff] }
 0x291   : > { %v1473_v14 = vpop.eup %1472  ;;  %v992_v62 = vadd.f32 %v971_v21, %v970_v18  ;;  %1486 = vpow2.f32 %v730_v45  ;;  %v956_v45 = vld [vmem:[#allocation4 + $0x30] sm:$0xff] }
 0x292   : > { %v1475_v20 = vpop.eup %1474  ;;  %v861_v37 = vadd.f32 %v1473_v14, %v1471_v28  ;;  %1488 = vpow2.f32 %v726_v31  ;;  %v743_v14 = vld [vmem:[#allocation3 + $0x38] sm:$0xff] }
 0x293   : > { %853 = vadd.xlane.f32.xlu0 %v852_v35  ;;  %v1477_v2 = vpop.eup %1476  ;;  %v843_v60 = vadd.f32 %v1475_v20, %v1469_v6  ;;  %1490 = vpow2.f32 %v728_v38 }
 0x294   : > { %862 = vadd.xlane.f32.xlu1 %v861_v37  ;;  %v1479_v46 = vpop.eup %1478  ;;  %1492 = vpow2.f32 %v734_v43  ;;  %v737_v37 = vld [vmem:[#allocation3 + $0x8] sm:$0xff] }
 0x295   : > { %v1481_v42 = vpop.eup %1480  ;;  %v846_v61 = vadd.f32 %v1479_v46, %v1477_v2  ;;  %1494 = vpow2.f32 %v722_v48 }
 0x296   : > { %v1483_v36 = vpop.eup %1482  ;;  %1496 = vpow2.f32 %v724_v32 }
 0x297   : > { %844 = vadd.xlane.f32.xlu0 %v843_v60  ;;  %v858_v0 = vadd.f32 %v1483_v36, %v1481_v42  ;;  %v1485_v54 = vpop.eup %1484  ;;  %1498 = vpow2.f32 %v732_v40  ;;  %v957_v60 = vld [vmem:[#allocation4 + $0x38] sm:$0xff]  ;;  %v738_v42 = vld [vmem:[#allocation3 + $0x10] sm:$0xff] }
 0x298   : > { %996 = vadd.xlane.f32.xlu1 %v995_v47  ;;  %v744_v19 = vmul.f32 %v1485_v54, %v736_v30 }
 0x29b   : > { %847 = vadd.xlane.f32.xlu0 %v846_v61 }
 0x29e   : > { %v1487_v29 = vpop.eup %1486 }
 0x29f   : > { %859 = vadd.xlane.f32.xlu0 %v858_v0  ;;  %v749_v51 = vmul.f32 %v1487_v29, %v741_v24  ;;  %v1489_v55 = vpop.eup %1488 }
 0x2a0   : > { %v1491_v41 = vpop.eup %1490  ;;  %v747_v50 = vmul.f32 %v1489_v55, %v739_v16 }
 0x2a1   : > { %v1493_v27 = vpop.eup %1492  ;;  %v748_v4 = vmul.f32 %v1491_v41, %v740_v9 }
 0x2a2   : > { %v1495_v8 = vpop.eup %1494  ;;  %v751_v35 = vmul.f32 %v1493_v27, %v743_v14 }
 0x2a3   : > { %993 = vadd.xlane.f32.xlu0 %v992_v62  ;;  %v745_v46 = vmul.f32 %v1495_v8, %v737_v37  ;;  %v1497_v47 = vpop.eup %1496 }
 0x2a4   : > { %v746_v18 = vmul.f32 %v1497_v47, %v738_v42  ;;  %v1499_v21 = vpop.eup %1498 }
 0x2f4   : > { %v979_v63 = vpop.xlane.xlu1 %978 }
 0x2f5   : > { %v999_v17 = vadd.f32 %v979_v63, %v951_v13  ;;  %v750_v63 = vmul.f32 %v1499_v21, %v742_v12 }
 0x2f7   : > { %1007 = vst.msk [vmem:[#allocation4 + $0x8] sm:$0xff] %vm872_vm1, %v999_v17 }
 0x2f8   : > { %v985_v10 = vpop.xlane.xlu1 %984 }
 0x2f9   : > { %v1001_v11 = vadd.f32 %v985_v10, %v953_v34 }
 0x2fb   : > { %1009 = vst.msk [vmem:[#allocation4 + $0x18] sm:$0xff] %vm872_vm1, %v1001_v11 }
 0x2fc   : > { %v991_v26 = vpop.xlane.xlu1 %990 }
 0x2fd   : > { %v1003_v33 = vadd.f32 %v991_v26, %v955_v53 }
 0x2ff   : > { %1011 = vst.msk [vmem:[#allocation4 + $0x28] sm:$0xff] %vm872_vm1, %v1003_v33 }
 0x301   : > { %v842_v22 = vpop.xlane.xlu1 %841 }
 0x302   : > { %v864_v23 = vadd.f32 %v842_v22, %v744_v19 }
 0x304   : > { %873 = vst.msk [vmem:[#allocation3] sm:$0xff] %vm872_vm1, %v864_v23 }
 0x30d   : > { %v857_v1 = vpop.xlane.xlu1 %856 }
 0x30e   : > { %v869_v7 = vadd.f32 %v857_v1, %v749_v51 }
 0x310   : > { %878 = vst.msk [vmem:[#allocation3 + $0x28] sm:$0xff] %vm872_vm1, %v869_v7  ;;  %v976_v39 = vpop.xlane.xlu0 %975 }
 0x311   : > { %v998_v44 = vadd.f32 %v976_v39, %v950_v3 }
 0x313   : > { %1006 = vst.msk [vmem:[#allocation4] sm:$0xff] %vm872_vm1, %v998_v44 }
 0x314   : > { %v982_v49 = vpop.xlane.xlu0 %981 }
 0x315   : > { %v1000_v15 = vadd.f32 %v982_v49, %v952_v5 }
 0x317   : > { %1008 = vst.msk [vmem:[#allocation4 + $0x10] sm:$0xff] %vm872_vm1, %v1000_v15 }
 0x318   : > { %v988_v56 = vpop.xlane.xlu0 %987 }
 0x319   : > { %v851_v6 = vpop.xlane.xlu1 %850  ;;  %v1002_v28 = vadd.f32 %v988_v56, %v954_v25 }
 0x31a   : > { %v867_v52 = vadd.f32 %v851_v6, %v747_v50 }
 0x31b   : > { %1010 = vst.msk [vmem:[#allocation4 + $0x20] sm:$0xff] %vm872_vm1, %v1002_v28 }
 0x31c   : > { %876 = vst.msk [vmem:[#allocation3 + $0x18] sm:$0xff] %vm872_vm1, %v867_v52  ;;  %v854_v20 = vpop.xlane.xlu0 %853 }
 0x31d   : > { %v863_v57 = vpop.xlane.xlu1 %862  ;;  %v868_v58 = vadd.f32 %v854_v20, %v748_v4 }
 0x31e   : > { %v871_v2 = vadd.f32 %v863_v57, %v751_v35 }
 0x31f   : > { %877 = vst.msk [vmem:[#allocation3 + $0x20] sm:$0xff] %vm872_vm1, %v868_v58 }
 0x320   : > { %880 = vst.msk [vmem:[#allocation3 + $0x38] sm:$0xff] %vm872_vm1, %v871_v2  ;;  %v845_v59 = vpop.xlane.xlu0 %844 }
 0x321   : > { %v997_v61 = vpop.xlane.xlu1 %996  ;;  %v865_v36 = vadd.f32 %v845_v59, %v745_v46 }
 0x322   : > { %v1005_v0 = vadd.f32 %v997_v61, %v957_v60 }
 0x323   : > { %874 = vst.msk [vmem:[#allocation3 + $0x8] sm:$0xff] %vm872_vm1, %v865_v36 }
 0x324   : > { %1013 = vst.msk [vmem:[#allocation4 + $0x38] sm:$0xff] %vm872_vm1, %v1005_v0  ;;  %v848_v62 = vpop.xlane.xlu0 %847 }
 0x325   : > { %v866_v13 = vadd.f32 %v848_v62, %v746_v18 }
 0x327   : > { %875 = vst.msk [vmem:[#allocation3 + $0x10] sm:$0xff] %vm872_vm1, %v866_v13 }
 0x328   : > { %v860_v17 = vpop.xlane.xlu0 %859 }
 0x329   : > { %v870_v34 = vadd.f32 %v860_v17, %v750_v63 }
 0x32b   : > { %879 = vst.msk [vmem:[#allocation3 + $0x30] sm:$0xff] %vm872_vm1, %v870_v34  ;;  %1017 = sbr.rel (%p1270_p12) target bundleno = 845 (0x34d), region = 52 }
 0x32c   : > { %v994_v10 = vpop.xlane.xlu0 %993 }
 0x32d   : > { %v1004_v11 = vadd.f32 %v994_v10, %v956_v45 }
 0x32f   : > { %1012 = vst.msk [vmem:[#allocation4 + $0x30] sm:$0xff] %vm872_vm1, %v1004_v11 }
 0x330   : > { %v1026_v53 = vld [vmem:[#allocation3] sm:$0xff]  ;;  %v1027_v54 = vld [vmem:[#allocation3 + $0x8] sm:$0xff]  ;;  %v1028_v26 = vld [vmem:[#allocation3 + $0x10] sm:$0xff] }
 0x331   : > { %1500 = vlog2.f32 %v1026_v53  ;;  %v1029_v30 = vld [vmem:[#allocation3 + $0x18] sm:$0xff]  ;;  %v1030_v33 = vld [vmem:[#allocation3 + $0x20] sm:$0xff]  ;;  %v1031_v19 = vld [vmem:[#allocation3 + $0x28] sm:$0xff] }
 0x332   : > { %1502 = vlog2.f32 %v1027_v54  ;;  %v1032_v22 = vld [vmem:[#allocation3 + $0x30] sm:$0xff]  ;;  %v1033_v23 = vld [vmem:[#allocation3 + $0x38] sm:$0xff]  ;;  %v1018_v38 = vld [vmem:[#allocation2] sm:$0xff] }
 0x333   : > { %1504 = vlog2.f32 %v1028_v26  ;;  %v1019_v24 = vld [vmem:[#allocation2 + $0x8] sm:$0xff]  ;;  %v1058_v51 = vld [vmem:[#allocation4] sm:$0xff]  ;;  %v1020_v7 = vld [vmem:[#allocation2 + $0x10] sm:$0xff] }
 0x334   : > { %1506 = vlog2.f32 %v1029_v30  ;;  %v1059_v39 = vld [vmem:[#allocation4 + $0x8] sm:$0xff]  ;;  %v1021_v5 = vld [vmem:[#allocation2 + $0x18] sm:$0xff]  ;;  %v1060_v55 = vld [vmem:[#allocation4 + $0x10] sm:$0xff] }
 0x335   : > { %1508 = vlog2.f32 %v1030_v33  ;;  %v1022_v16 = vld [vmem:[#allocation2 + $0x20] sm:$0xff]  ;;  %v1061_v56 = vld [vmem:[#allocation4 + $0x18] sm:$0xff]  ;;  %v1023_v27 = vld [vmem:[#allocation2 + $0x28] sm:$0xff] }
 0x336   : > { %1510 = vlog2.f32 %v1031_v19  ;;  %v1062_v52 = vld [vmem:[#allocation4 + $0x20] sm:$0xff]  ;;  %v1024_v8 = vld [vmem:[#allocation2 + $0x30] sm:$0xff]  ;;  %v1063_v57 = vld [vmem:[#allocation4 + $0x28] sm:$0xff] }
 0x337   : > { %1512 = vlog2.f32 %v1032_v22  ;;  %v1025_v2 = vld [vmem:[#allocation2 + $0x38] sm:$0xff]  ;;  %v1064_v47 = vld [vmem:[#allocation4 + $0x30] sm:$0xff] }
 0x338   : > { %1514 = vlog2.f32 %v1033_v23  ;;  %v1065_v36 = vld [vmem:[#allocation4 + $0x38] sm:$0xff] }
 0x33e   : > { %v1501_v31 = vpop.eup %1500 }
 0x33f   : > { %v1503_v43 = vpop.eup %1502  ;;  %v1035_v29 = vmul.f32 0.6931472, %v1501_v31 }
 0x340   : > { %v1505_v48 = vpop.eup %1504  ;;  %v1037_v1 = vmul.f32 0.6931472, %v1503_v43 }
 0x341   : > { %v1507_v3 = vpop.eup %1506  ;;  %v1050_v32 = vadd.f32 %v1035_v29, %v1018_v38  ;;  %v1039_v44 = vmul.f32 0.6931472, %v1505_v48 }
 0x342   : > { %v1509_v40 = vpop.eup %1508  ;;  %v1051_v49 = vadd.f32 %v1037_v1, %v1019_v24  ;;  %v1041_v15 = vmul.f32 0.6931472, %v1507_v3 }
 0x343   : > { %v1511_v25 = vpop.eup %1510  ;;  %v1066_v41 = vsub.f32 %v1058_v51, %v1050_v32  ;;  %v1052_v50 = vadd.f32 %v1039_v44, %v1020_v7  ;;  %v1043_v9 = vmul.f32 0.6931472, %v1509_v40 }
 0x344   : > { %v1513_v6 = vpop.eup %1512  ;;  %v1067_v28 = vsub.f32 %v1059_v39, %v1051_v49  ;;  %v1053_v14 = vadd.f32 %v1041_v15, %v1021_v5  ;;  %v1045_v4 = vmul.f32 0.6931472, %v1511_v25 }
 0x345   : > { %v1515_v35 = vpop.eup %1514  ;;  %1074 = vst.msk [vmem:[%s1812_s5] sm:$0xff] %vm872_vm1, %v1066_v41  ;;  %v1068_v20 = vsub.f32 %v1060_v55, %v1052_v50  ;;  %v1054_v37 = vadd.f32 %v1043_v9, %v1022_v16  ;;  %v1047_v58 = vmul.f32 0.6931472, %v1513_v6 }
 0x346   : > { %1075 = vst.msk [vmem:[%s1812_s5 + $0x8] sm:$0xff] %vm872_vm1, %v1067_v28  ;;  %v1069_v60 = vsub.f32 %v1061_v56, %v1053_v14  ;;  %v1055_v46 = vadd.f32 %v1045_v4, %v1023_v27  ;;  %v1049_v59 = vmul.f32 0.6931472, %v1515_v35 }
 0x347   : > { %1076 = vst.msk [vmem:[%s1812_s5 + $0x10] sm:$0xff] %vm872_vm1, %v1068_v20  ;;  %v1070_v42 = vsub.f32 %v1062_v52, %v1054_v37  ;;  %v1056_v61 = vadd.f32 %v1047_v58, %v1024_v8 }
 0x348   : > { %1077 = vst.msk [vmem:[%s1812_s5 + $0x18] sm:$0xff] %vm872_vm1, %v1069_v60  ;;  %v1071_v0 = vsub.f32 %v1063_v57, %v1055_v46  ;;  %v1057_v18 = vadd.f32 %v1049_v59, %v1025_v2 }
 0x349   : > { %1078 = vst.msk [vmem:[%s1812_s5 + $0x20] sm:$0xff] %vm872_vm1, %v1070_v42  ;;  %v1072_v21 = vsub.f32 %v1064_v47, %v1056_v61 }
 0x34a   : > { %1079 = vst.msk [vmem:[%s1812_s5 + $0x28] sm:$0xff] %vm872_vm1, %v1071_v0  ;;  %v1073_v62 = vsub.f32 %v1065_v36, %v1057_v18 }
 0x34b   : > { %1080 = vst.msk [vmem:[%s1812_s5 + $0x30] sm:$0xff] %vm872_vm1, %v1072_v21 }
 0x34c   : > { %1081 = vst.msk [vmem:[%s1812_s5 + $0x38] sm:$0xff] %vm872_vm1, %v1073_v62 }
 0x34d PF: > { %s20_s22 = sadd.s32 1, %s1642_s22   ;;  %s2177_s14 = sld [smem:[#allocation11_spill]] }
 0x34e   : > { %p17_p4 = scmp.ge.s32.totalorder %s20_s22, 10   ;;  %s2178_s30 = sld [smem:[#allocation12_spill]] }
 0x34f   : > { %s2179_s15 = smov %s1618_s16  ;;  %s2180_s16 = smov %s1622_s17 }
 0x350   : > { %s2181_s17 = smov %s1735_s29  ;;  %s2182_s18 = smov %s1634_s20 }
 0x351   : > { %s2183_s19 = smov %s1638_s21  ;;  %19 = sbr.rel (!%p17_p4) target bundleno = 9 (0x9), region = 103 }
 0x353   : > { %s2184_s20 = smov %s2177_s14 }
 0x354   : > { %s2185_s21 = smov %s2178_s30 }
 0x356   :  { %1104 = vsyncpa [#allocation6], 1 }
 0x357   :  { %1106 = vsyncpa [#allocation6 + $0x1], 1 }
 0x358   :  { %1107 = vsyncpa [#allocation8], 1 }
 0x359   :  { %1109 = vsyncpa [#allocation8 + $0x1], 1 }

</bundles_post_ra>
